<compile_context>
chip_gen: v7x
topology: tpu7x:2x2x1
jax: 0.10.0
libtpu: 0.0.40
codegen_flags: <defaults>
</compile_context>

<pallas_src>
import functools
import math

import jax
import jax.numpy as jnp
from jax.experimental import pallas as pl
from jax.experimental.pallas import tpu as pltpu

_LANE = 128
_CHUNK_ROWS = 16               # (16,128): 1 bf16 vreg / 2 f32 vregs per operand chunk
_TARGET_BLOCK_BYTES = 2 << 20  # ~2 MiB per input block -> ~85% HBM-roofline band
_UNROLL = 4
_LN2 = math.log(2.0)


def _detect_num_tensorcores():
    """Best-effort TensorCore-per-device count (2 on v7x-class, else 1)."""
    try:
        info = pltpu.get_tpu_info()
        for name in ("num_cores", "core_count", "num_tensorcores",
                     "tensor_core_count", "tensorcores_per_chip", "cores_per_chip"):
            v = getattr(info, name, None)
            if isinstance(v, int) and v >= 1:
                return min(v, 2)
    except Exception:
        pass
    try:
        v = getattr(jax.devices()[0], "num_cores", None)
        if isinstance(v, int) and v >= 1:
            return min(v, 2)
    except Exception:
        pass
    return 1


_NUM_TC = _detect_num_tensorcores()


def _combined_loss_kernel(x_ref, y_ref, o_ref, *, tile_rows, blocks_per_split,
                          total_rows, need_mask):
    """Accumulate per-split (4, 16, 128) partial sums of [bce, p*y, p, y]."""

    @pl.when(pl.program_id(1) == 0)
    def _init():
        o_ref[...] = jnp.zeros_like(o_ref)

    n_chunks = tile_rows // _CHUNK_ROWS
    unroll = min(_UNROLL, n_chunks)
    block_row0 = (pl.program_id(0) * blocks_per_split + pl.program_id(1)) * tile_rows

    def accumulate(masked):
        def body(c, carry):
            a_bce, a_py, a_p, a_y = carry
            r0 = pl.multiple_of(c * _CHUNK_ROWS, _CHUNK_ROWS)
            x = x_ref[pl.ds(r0, _CHUNK_ROWS), :].astype(jnp.float32)
            y = y_ref[pl.ds(r0, _CHUNK_ROWS), :].astype(jnp.float32)
            s = jax.nn.sigmoid(x)
            # Stable BCE-with-logits: max(x,0) - x*y + log1p(exp(-|x|)),
            # using log1p(exp(-|x|)) == -log(max(s, 1-s)) -> only 2 EUP ops/elem.
            bce = jnp.maximum(x, 0.0) - x * y - jnp.log(jnp.maximum(s, 1.0 - s))
            py = s * y
            if masked:
                # Boundary/overhang block only: rows at/after `total_rows` hold
                # undefined data from the clamped DMA (possibly NaN/Inf) -> zero.
                rid = (block_row0 + r0 +
                       jax.lax.broadcasted_iota(jnp.int32, (_CHUNK_ROWS, _LANE), 0))
                valid = rid < total_rows
                bce = jnp.where(valid, bce, 0.0)
                py = jnp.where(valid, py, 0.0)
                s = jnp.where(valid, s, 0.0)
                y = jnp.where(valid, y, 0.0)
            return (a_bce + bce, a_py + py, a_p + s, a_y + y)

        zero = jnp.zeros((_CHUNK_ROWS, _LANE), jnp.float32)
        a_bce, a_py, a_p, a_y = jax.lax.fori_loop(
            0, n_chunks, body, (zero, zero, zero, zero), unroll=unroll)
        o_ref[0] += a_bce      # sum of BCE terms
        o_ref[1] += a_py       # intersection sum(p * y)
        o_ref[2] += a_p        # sum of sigmoid(pred)
        o_ref[3] += a_y        # sum of target

    if need_mask:
        is_full = block_row0 + tile_rows <= total_rows
        has_rows = block_row0 < total_rows

        @pl.when(is_full)
        def _fast():
            accumulate(masked=False)

        @pl.when(jnp.logical_and(has_rows, jnp.logical_not(is_full)))
        def _boundary():
            accumulate(masked=True)
    else:
        accumulate(masked=False)


def _round_up(v, m):
    return ((v + m - 1) // m) * m


@functools.partial(jax.jit, static_argnames=("alpha", "beta", "smooth"))
def combined_loss(predicted, target, alpha=1.0, beta=1.0, smooth=1e-5):
    n = predicted.size                      # static (shape-derived)
    assert target.size == n

    itemsize = max(jnp.dtype(predicted.dtype).itemsize,
                   jnp.dtype(target.dtype).itemsize)
    # Sublane multiple for the packed dtype (and the chunk size).
    row_mult = max(_CHUNK_ROWS, 32 // itemsize)
    max_tile_rows = max(
        row_mult,
        (_TARGET_BLOCK_BYTES // (_LANE * itemsize)) // row_mult * row_mult)

    num_tc = max(1, _NUM_TC)
    rows0 = pl.cdiv(n, _LANE)               # rows after lane (128) padding
    per_split = pl.cdiv(rows0, num_tc)
    tile_rows = min(max_tile_rows, _round_up(per_split, row_mult))

    # Small inputs (single block): pad a handful of rows so the kernel is
    # mask-free.  Large inputs are never row-padded (that would be an extra full
    # HBM pass); their boundary block is masked in-kernel instead.
    rows = rows0 if rows0 >= tile_rows else tile_rows

    total_blocks = pl.cdiv(rows, tile_rows)
    num_splits = min(num_tc, total_blocks)
    blocks_per_split = pl.cdiv(total_blocks, num_splits)
    cover_rows = num_splits * blocks_per_split * tile_rows
    need_mask = cover_rows != rows
    pad = rows * _LANE - n                  # zero elements appended (static)

    x = predicted.reshape(-1)               # keep native dtype; cast in-kernel
    y = target.reshape(-1)
    if pad:
        # TODO(synk): for large inputs whose size is not a multiple of 128 this
        # jnp.pad is one extra HBM pass; a fully pad-free path would need a ragged
        # 1-D tail kernel.  128-aligned inputs take the copy-free path.
        x = jnp.pad(x, (0, pad))
        y = jnp.pad(y, (0, pad))
    x2 = x.reshape(rows, _LANE)
    y2 = y.reshape(rows, _LANE)

    last_block = total_blocks - 1
    if num_splits * blocks_per_split == total_blocks:
        def in_idx(c, i):
            return (c * blocks_per_split + i, 0)
    else:
        def in_idx(c, i):
            # Clamp the (skipped) overhang blocks of the last split so their DMA
            # never starts past the array; the kernel gates their accumulation off.
            return (jnp.minimum(c * blocks_per_split + i, last_block), 0)

    in_spec = pl.BlockSpec((tile_rows, _LANE), in_idx)
    out_spec = pl.BlockSpec((4, _CHUNK_ROWS, _LANE), lambda c, i: (c, 0, 0))

    kernel = functools.partial(
        _combined_loss_kernel,
        tile_rows=tile_rows,
        blocks_per_split=blocks_per_split,
        total_rows=rows,
        need_mask=need_mask,
    )

    partials = pl.pallas_call(
        kernel,
        out_shape=jax.ShapeDtypeStruct((num_splits * 4, _CHUNK_ROWS, _LANE),
                                       jnp.float32),
        grid=(num_splits, blocks_per_split),
        in_specs=[in_spec, in_spec],
        out_specs=out_spec,
        compiler_params=pltpu.CompilerParams(
            dimension_semantics=("parallel", "arbitrary"),
            vmem_limit_bytes=32 * 1024 * 1024),
    )(x2, y2)

    # Tiny final reduction done by XLA in the wrapper.
    sums = partials.reshape(num_splits, 4, _CHUNK_ROWS, _LANE).sum(axis=(0, 2, 3))
    # Each zero-pad element (x=0, y=0) contributes exactly ln(2) to the BCE sum
    # and 0.5 to sum(sigmoid); correct analytically instead of masking in-kernel.
    sum_bce = sums[0] - pad * _LN2
    sum_py = sums[1]
    sum_p = sums[2] - pad * 0.5
    sum_y = sums[3]

    bce_loss = sum_bce / jnp.float32(n)                           # mean reduction
    dice_coeff = (2.0 * sum_py + smooth) / (sum_p + sum_y + smooth)
    dice_loss = 1.0 - dice_coeff
    combined = dice_loss * alpha + bce_loss * beta
    # TODO(synk): PyTorch forward returns [dice.item(), bce.item()] (host floats);
    # here they stay as JAX scalars.
    return combined, dice_loss, bce_loss


def _reference(predicted, target, alpha=1.0, beta=1.0, smooth=1e-5):
    x = predicted.astype(jnp.float32)
    y = target.astype(jnp.float32)
    bce = jnp.mean(jnp.maximum(x, 0.0) - x * y + jnp.log1p(jnp.exp(-jnp.abs(x))))
    p = jax.nn.sigmoid(x)
    inter = jnp.sum(p * y)
    union = jnp.sum(p) + jnp.sum(y)
    dice = 1.0 - (2.0 * inter + smooth) / (union + smooth)
    return dice * alpha + bce * beta, dice, bce


def _check(pred, tgt, rtol=1e-3, atol=1e-4):
    c, d, b = combined_loss(pred, tgt)
    jax.block_until_ready(c)
    rc, rd, rb = _reference(pred, tgt)
    assert jnp.allclose(c, rc, rtol=rtol, atol=atol), (c, rc)
    assert jnp.allclose(d, rd, rtol=rtol, atol=atol), (d, rd)
    assert jnp.allclose(b, rb, rtol=rtol, atol=atol), (b, rb)


if __name__ == "__main__":
    key = jax.random.PRNGKey(0)
    k1, k2, k3, k4, k5, k6 = jax.random.split(key, 6)

    # Typical segmentation use: NCHW logits + binary mask (128-aligned, copy-free).
    predicted = jax.random.normal(k1, (2, 4, 16, 16), dtype=jnp.float32)
    target = jax.random.bernoulli(k2, 0.5, (2, 4, 16, 16)).astype(jnp.float32)
    _check(predicted, target)

    # Non-128-aligned small shape: exercises padding + analytic pad correction.
    p2 = jax.random.normal(k3, (2, 3, 7, 5), dtype=jnp.float32)
    t2 = jax.random.bernoulli(k4, 0.5, (2, 3, 7, 5)).astype(jnp.float32)
    _check(p2, t2)

    # Multi-block shape: exercises the pl.when-gated boundary-mask path.
    p3 = jax.random.normal(k5, (2, 4, 300, 257), dtype=jnp.float32)
    t3 = jax.random.bernoulli(k6, 0.5, (2, 4, 300, 257)).astype(jnp.float32)
    _check(p3, t3)

    print("KERNEL_OK")
</pallas_src>

<mosaic_0001>
module attributes {stable_mosaic.version = 11 : i64} {
  func.func @_combined_loss_kernel(%arg0: i32, %arg1: i32, %arg2: memref<16x128xf32, #tpu.memory_space<vmem>>, %arg3: memref<16x128xf32, #tpu.memory_space<vmem>>, %arg4: memref<4x16x128xf32, #tpu.memory_space<vmem>>) attributes {dimension_semantics = [#tpu.dimension_semantics<parallel>, #tpu.dimension_semantics<arbitrary>], iteration_bounds = array<i64: 1, 1>, scalar_prefetch = 0 : i64, scratch_operands = 0 : i64, tpu.core_type = #tpu.core_type<tc>, window_params = [{transform_indices = @transform_0, window_bounds = array<i64: 16, 128>}, {transform_indices = @transform_1, window_bounds = array<i64: 16, 128>}, {transform_indices = @transform_2, window_bounds = array<i64: 4, 16, 128>}]} {
    %c0_i32 = arith.constant 0 : i32
    %0 = arith.cmpi eq, %arg1, %c0_i32 : i32
    %1 = arith.extui %0 : i1 to i32
    %c0_i32_0 = arith.constant 0 : i32
    %2 = arith.cmpi ne, %1, %c0_i32_0 : i32
    scf.if %2 {
      %cst_27 = arith.constant 0.000000e+00 : f32
      %53 = vector.broadcast %cst_27 : f32 to vector<4x16x128xf32>
      %c0_28 = arith.constant 0 : index
      %c0_29 = arith.constant 0 : index
      %c0_30 = arith.constant 0 : index
      %54 = vector.load %arg4[%c0_28, %c0_29, %c0_30] : memref<4x16x128xf32, #tpu.memory_space<vmem>>, vector<4x16x128xf32>
      tpu.vector_store %arg4[%c0_28, %c0_29, %c0_30], %53 {strides = array<i32>} : memref<4x16x128xf32, #tpu.memory_space<vmem>>, vector<4x16x128xf32>,
    } else {
    }
    %cst = arith.constant 0.000000e+00 : f32
    %3 = vector.broadcast %cst : f32 to vector<16x128xf32>
    %c0_i32_1 = arith.constant 0 : i32
    %c16_i32 = arith.constant 16 : i32
    %4 = arith.muli %c0_i32_1, %c16_i32 : i32
    %5 = tpu.assume_multiple %4, 16 : i32
    %6 = arith.index_cast %5 : i32 to index
    %c0 = arith.constant 0 : index
    %7 = vector.load %arg2[%6, %c0] : memref<16x128xf32, #tpu.memory_space<vmem>>, vector<16x128xf32>
    %8 = arith.index_cast %5 : i32 to index
    %c0_2 = arith.constant 0 : index
    %9 = vector.load %arg3[%8, %c0_2] : memref<16x128xf32, #tpu.memory_space<vmem>>, vector<16x128xf32>
    %10 = arith.negf %7 : vector<16x128xf32>
    %11 = math.exp %10 : vector<16x128xf32>
    %cst_3 = arith.constant 1.000000e+00 : f32
    %12 = vector.broadcast %cst_3 : f32 to vector<16x128xf32>
    %13 = arith.addf %12, %11 : vector<16x128xf32>
    %14 = arith.divf %12, %13 : vector<16x128xf32>
    %cst_4 = arith.constant 0.000000e+00 : f32
    %15 = vector.broadcast %cst_4 : f32 to vector<16x128xf32>
    %16 = arith.maximumf %7, %15 : vector<16x128xf32>
    %17 = arith.mulf %7, %9 : vector<16x128xf32>
    %18 = arith.subf %16, %17 : vector<16x128xf32>
    %cst_5 = arith.constant 1.000000e+00 : f32
    %19 = vector.broadcast %cst_5 : f32 to vector<16x128xf32>
    %20 = arith.subf %19, %14 : vector<16x128xf32>
    %21 = arith.maximumf %14, %20 : vector<16x128xf32>
    %22 = math.log %21 : vector<16x128xf32>
    %23 = arith.subf %18, %22 : vector<16x128xf32>
    %24 = arith.mulf %14, %9 : vector<16x128xf32>
    %25 = arith.addf %3, %23 : vector<16x128xf32>
    %26 = arith.addf %3, %24 : vector<16x128xf32>
    %27 = arith.addf %3, %14 : vector<16x128xf32>
    %28 = arith.addf %3, %9 : vector<16x128xf32>
    %c1_i32 = arith.constant 1 : i32
    %c0_6 = arith.constant 0 : index
    %c0_7 = arith.constant 0 : index
    %c0_8 = arith.constant 0 : index
    %29 = vector.load %arg4[%c0_6, %c0_7, %c0_8] : memref<4x16x128xf32, #tpu.memory_space<vmem>>, vector<1x16x128xf32>
    %30 = vector.shape_cast %29 : vector<1x16x128xf32> to vector<16x128xf32>
    %31 = arith.addf %30, %25 : vector<16x128xf32>
    %c0_9 = arith.constant 0 : index
    %c0_10 = arith.constant 0 : index
    %c0_11 = arith.constant 0 : index
    %32 = vector.load %arg4[%c0_9, %c0_10, %c0_11] : memref<4x16x128xf32, #tpu.memory_space<vmem>>, vector<1x16x128xf32>
    %33 = vector.shape_cast %32 : vector<1x16x128xf32> to vector<16x128xf32>
    %34 = vector.shape_cast %31 : vector<16x128xf32> to vector<1x16x128xf32>
    tpu.vector_store %arg4[%c0_9, %c0_10, %c0_11], %34 {strides = array<i32>} : memref<4x16x128xf32, #tpu.memory_space<vmem>>, vector<1x16x128xf32>,
    %c1 = arith.constant 1 : index
    %c0_12 = arith.constant 0 : index
    %c0_13 = arith.constant 0 : index
    %35 = vector.load %arg4[%c1, %c0_12, %c0_13] : memref<4x16x128xf32, #tpu.memory_space<vmem>>, vector<1x16x128xf32>
    %36 = vector.shape_cast %35 : vector<1x16x128xf32> to vector<16x128xf32>
    %37 = arith.addf %36, %26 : vector<16x128xf32>
    %c1_14 = arith.constant 1 : index
    %c0_15 = arith.constant 0 : index
    %c0_16 = arith.constant 0 : index
    %38 = vector.load %arg4[%c1_14, %c0_15, %c0_16] : memref<4x16x128xf32, #tpu.memory_space<vmem>>, vector<1x16x128xf32>
    %39 = vector.shape_cast %38 : vector<1x16x128xf32> to vector<16x128xf32>
    %40 = vector.shape_cast %37 : vector<16x128xf32> to vector<1x16x128xf32>
    tpu.vector_store %arg4[%c1_14, %c0_15, %c0_16], %40 {strides = array<i32>} : memref<4x16x128xf32, #tpu.memory_space<vmem>>, vector<1x16x128xf32>,
    %c2 = arith.constant 2 : index
    %c0_17 = arith.constant 0 : index
    %c0_18 = arith.constant 0 : index
    %41 = vector.load %arg4[%c2, %c0_17, %c0_18] : memref<4x16x128xf32, #tpu.memory_space<vmem>>, vector<1x16x128xf32>
    %42 = vector.shape_cast %41 : vector<1x16x128xf32> to vector<16x128xf32>
    %43 = arith.addf %42, %27 : vector<16x128xf32>
    %c2_19 = arith.constant 2 : index
    %c0_20 = arith.constant 0 : index
    %c0_21 = arith.constant 0 : index
    %44 = vector.load %arg4[%c2_19, %c0_20, %c0_21] : memref<4x16x128xf32, #tpu.memory_space<vmem>>, vector<1x16x128xf32>
    %45 = vector.shape_cast %44 : vector<1x16x128xf32> to vector<16x128xf32>
    %46 = vector.shape_cast %43 : vector<16x128xf32> to vector<1x16x128xf32>
    tpu.vector_store %arg4[%c2_19, %c0_20, %c0_21], %46 {strides = array<i32>} : memref<4x16x128xf32, #tpu.memory_space<vmem>>, vector<1x16x128xf32>,
    %c3 = arith.constant 3 : index
    %c0_22 = arith.constant 0 : index
    %c0_23 = arith.constant 0 : index
    %47 = vector.load %arg4[%c3, %c0_22, %c0_23] : memref<4x16x128xf32, #tpu.memory_space<vmem>>, vector<1x16x128xf32>
    %48 = vector.shape_cast %47 : vector<1x16x128xf32> to vector<16x128xf32>
    %49 = arith.addf %48, %28 : vector<16x128xf32>
    %c3_24 = arith.constant 3 : index
    %c0_25 = arith.constant 0 : index
    %c0_26 = arith.constant 0 : index
    %50 = vector.load %arg4[%c3_24, %c0_25, %c0_26] : memref<4x16x128xf32, #tpu.memory_space<vmem>>, vector<1x16x128xf32>
    %51 = vector.shape_cast %50 : vector<1x16x128xf32> to vector<16x128xf32>
    %52 = vector.shape_cast %49 : vector<16x128xf32> to vector<1x16x128xf32>
    tpu.vector_store %arg4[%c3_24, %c0_25, %c0_26], %52 {strides = array<i32>} : memref<4x16x128xf32, #tpu.memory_space<vmem>>, vector<1x16x128xf32>,
    return
  }
  func.func @transform_0(%arg0: i32, %arg1: i32) -> (i32, i32) {
    %c1_i32 = arith.constant 1 : i32
    %0 = arith.muli %arg0, %c1_i32 : i32
    %1 = arith.addi %0, %arg1 : i32
    %c0_i32 = arith.constant 0 : i32
    %c0_i32_0 = arith.constant 0 : i32
    return %1, %c0_i32 : i32, i32
  }
  func.func @transform_1(%arg0: i32, %arg1: i32) -> (i32, i32) {
    %c1_i32 = arith.constant 1 : i32
    %0 = arith.muli %arg0, %c1_i32 : i32
    %1 = arith.addi %0, %arg1 : i32
    %c0_i32 = arith.constant 0 : i32
    %c0_i32_0 = arith.constant 0 : i32
    return %1, %c0_i32 : i32, i32
  }
  func.func @transform_2(%arg0: i32, %arg1: i32) -> (i32, i32, i32) {
    %c0_i32 = arith.constant 0 : i32
    %c0_i32_0 = arith.constant 0 : i32
    %c0_i32_1 = arith.constant 0 : i32
    return %arg0, %c0_i32, %c0_i32_0 : i32, i32, i32
  }
}

</mosaic_0001>

<bundles_post_ra>
// kernel: combined_loss.1
= control target key start
LH: loop header
LB: loop body
LE: loop exit
PB: predicated region body
PF: predicated region fallthrough
CT: control target
= control target key end

     0   :  { %s230_s0 = inlined_call_operand.vmem [shape: f32[16,128], index: 0, kind: input, shape index: {}]   ;;  %s231_s1 = inlined_call_operand.vmem [shape: f32[16,128], index: 1, kind: input, shape index: {}]   ;;  %s232_s2 = inlined_call_operand.vmem [shape: f32[4,16,128], index: 2, kind: output, shape index: {}]  }
   0x1   :  { %v67_v0 = vld [vmem:[%s230_s0] sm:$0xff]  ;;  %v68_v1 = vld [vmem:[%s230_s0 + $0x8] sm:$0xff] }
   0x2   :  { %v69_v2 = vld [vmem:[%s231_s1] sm:$0xff]  ;;  %v152_v3 = vmul.f32 -1.442695, %v67_v0  ;;  %v70_v4 = vld [vmem:[%s231_s1 + $0x8] sm:$0xff]  ;;  %v153_v5 = vmul.f32 -1.442695, %v68_v1 }
   0x3   :  { %164 = vst [vmem:[%s232_s2 + $0x30] sm:$0xff] %v69_v2  ;;  %165 = vst [vmem:[%s232_s2 + $0x38] sm:$0xff] %v70_v4  ;;  %v83_v18 = vmax.f32 %v67_v0, 0.0  ;;  %v85_v19 = vmul.f32 %v69_v2, %v67_v0  ;;  %v84_v20 = vmax.f32 %v68_v1, 0.0  ;;  %v86_v21 = vmul.f32 %v70_v4, %v68_v1 }
   0x4   :  { %167 = vpow2.f32 %v152_v3 }
   0x5   :  { %169 = vpow2.f32 %v153_v5  ;;  %v87_v22 = vsub.f32 %v83_v18, %v85_v19  ;;  %v88_v24 = vsub.f32 %v84_v20, %v86_v21 }
   0xe   :  { %v168_v6 = vpop.eup %167 }
   0xf   :  { %v170_v7 = vpop.eup %169  ;;  %v77_v8 = vadd.f32 1.0, %v168_v6 }
  0x10   :  { %v78_v9 = vadd.f32 1.0, %v170_v7 }
  0x11   :  { %171 = vrcp.f32 %v77_v8 }
  0x12   :  { %173 = vrcp.f32 %v78_v9 }
  0x1b   :  { %v172_v10 = vpop.eup %171 }
  0x1c   :  { %v174_v11 = vpop.eup %173  ;;  %v89_v12 = vsub.f32 1.0, %v172_v10  ;;  %v99_v13 = vmul.f32 %v172_v10, %v69_v2  ;;  %160 = vst [vmem:[%s232_s2 + $0x20] sm:$0xff] %v172_v10 }
  0x1d   :  { %v90_v14 = vsub.f32 1.0, %v174_v11  ;;  %v100_v15 = vmul.f32 %v174_v11, %v70_v4  ;;  %161 = vst [vmem:[%s232_s2 + $0x28] sm:$0xff] %v174_v11 }
  0x1e   :  { %v91_v16 = vmax.f32 %v172_v10, %v89_v12  ;;  %156 = vst [vmem:[%s232_s2 + $0x10] sm:$0xff] %v99_v13 }
  0x1f   :  { %v92_v17 = vmax.f32 %v174_v11, %v90_v14  ;;  %157 = vst [vmem:[%s232_s2 + $0x18] sm:$0xff] %v100_v15 }
  0x20   :  { %175 = vlog2.f32 %v91_v16 }
  0x21   :  { %177 = vlog2.f32 %v92_v17 }
  0x2a   :  { %v176_v23 = vpop.eup %175 }
  0x2b   :  { %v178_v25 = vpop.eup %177  ;;  %v94_v26 = vmul.f32 0.6931472, %v176_v23 }
  0x2c   :  { %v96_v27 = vmul.f32 0.6931472, %v178_v25 }
  0x2d   :  { %v97_v28 = vsub.f32 %v87_v22, %v94_v26 }
  0x2e   :  { %v98_v29 = vsub.f32 %v88_v24, %v96_v27 }
  0x2f   :  { %113 = vst [vmem:[%s232_s2] sm:$0xff] %v97_v28 }
  0x30   :  { %114 = vst [vmem:[%s232_s2 + $0x8] sm:$0xff] %v98_v29 }

</bundles_post_ra>
